<compile_context>
chip_gen: v7x
topology: tpu7x:2x2x1
jax: 0.10.0
libtpu: 0.0.40
codegen_flags: <defaults>
</compile_context>

<pallas_src>
import jax
import jax.numpy as jnp
from jax.experimental import pallas as pl
from jax.experimental.pallas import tpu as pltpu


def _round_up(n, m):
    return ((n + m - 1) // m) * m


def _device_kind():
    try:
        return jax.devices()[0].device_kind.lower()
    except Exception:  # no devices / CPU fallback
        return ""


def mlp_kernel(x_ref, w1_ref, b1_ref, w2_ref, b2_ref, o_ref, acc_ref):
    """One (batch-tile, hidden-chunk) step of relu(x @ W1 + b1) @ W2 + b2."""
    k = pl.program_id(1)

    @pl.when(k == 0)
    def _():
        acc_ref[...] = jnp.zeros_like(acc_ref)

    # Hidden chunk: bf16 operands, f32 MXU accumulation; bias + ReLU in f32
    # (v5e has no bf16 VPU).
    h = jnp.dot(x_ref[...], w1_ref[...], preferred_element_type=jnp.float32)
    h = jnp.maximum(h + b1_ref[...], 0.0)
    # Dropout (eval mode) -> identity.
    # TODO(synk): training-mode dropout would use pltpu.prng_seed(...) +
    #             pltpu.stateful_bernoulli and 1/(1-p) scaling here.
    acc_ref[...] += jnp.dot(h.astype(jnp.bfloat16), w2_ref[...],
                            preferred_element_type=jnp.float32)

    @pl.when(k == pl.num_programs(1) - 1)
    def _():
        o_ref[...] = (acc_ref[...] + b2_ref[...]).astype(o_ref.dtype)


def prepare_mlp_params(w1, b1, w2, b2, *, hid_tile=512):
    """One-time: pad weights/biases to lane-dense shapes and cast to bf16/f32.

    Weights are (in_features, out_features) — transposed PyTorch layout.
    Zero padding is exact: padded contraction rows/cols contribute 0, padded
    hidden units get bias 0 -> relu(0) = 0, padded output columns are sliced
    off in mlp_forward.
    """
    in_f, hid = w1.shape
    out_f = w2.shape[1]
    assert w2.shape[0] == hid

    in_p = _round_up(in_f, 128)                    # contraction dim
    tk = min(hid_tile, _round_up(hid, 128))        # hidden chunk (multiple of 128)
    hid_p = _round_up(hid, tk)                     # hidden padded to chunk multiple
    out_p = _round_up(out_f, 128)                  # lane-dense output -> unmasked vst

    w1_p = jnp.zeros((in_p, hid_p), jnp.bfloat16).at[:in_f, :hid].set(
        w1.astype(jnp.bfloat16))
    b1_p = jnp.zeros((1, hid_p), jnp.float32).at[:, :hid].set(
        b1.reshape(1, -1).astype(jnp.float32))
    w2_p = jnp.zeros((hid_p, out_p), jnp.bfloat16).at[:hid, :out_f].set(
        w2.astype(jnp.bfloat16))
    b2_p = jnp.zeros((1, out_p), jnp.float32).at[:, :out_f].set(
        b2.reshape(1, -1).astype(jnp.float32))

    meta = dict(in_f=in_f, hid=hid, out_f=out_f,
                in_p=in_p, hid_p=hid_p, out_p=out_p, tk=tk)
    return (w1_p, b1_p, w2_p, b2_p), meta


def mlp_forward(x, padded_params, meta, *, block_m=None, out_dtype=jnp.float32):
    """x: (B, ...) flattened to (B, input_size). padded_params from prepare_mlp_params."""
    w1_p, b1_p, w2_p, b2_p = padded_params
    in_f, out_f = meta["in_f"], meta["out_f"]
    in_p, hid_p, out_p, tk = meta["in_p"], meta["hid_p"], meta["out_p"], meta["tk"]

    B = x.shape[0]
    x2d = x.reshape(B, -1)
    assert x2d.shape[1] == in_f

    # Generation-tuned tile / VMEM defaults.
    kind = _device_kind()
    if block_m is None:
        block_m = 512 if ("v5" in kind or "v6" in kind) else 256
    if "v5" in kind or "v6" in kind:
        vmem_limit = 64 * 1024 * 1024          # 128 MiB physical VMEM
    elif "v7" in kind:
        vmem_limit = 32 * 1024 * 1024          # 64 MiB physical VMEM
    else:
        vmem_limit = None                      # compiler default

    # Batch padded only to the sublane multiple; partial last tile is fine.
    Bp = _round_up(B, 8)
    tm = min(block_m, Bp)
    if Bp <= block_m and Bp >= 16:
        # Split into >= 2 grid steps so "parallel" can use both v7x TensorCores.
        tm = _round_up(pl.cdiv(Bp, 2), 8)
    grid_m = pl.cdiv(Bp, tm)
    n_k = hid_p // tk

    # Only per-call data movement: pad + bf16-cast the activations.
    x_p = jnp.zeros((Bp, in_p), jnp.bfloat16).at[:B, :in_f].set(
        x2d.astype(jnp.bfloat16))

    out_padded = pl.pallas_call(
        mlp_kernel,
        out_shape=jax.ShapeDtypeStruct((Bp, out_p), out_dtype),
        grid_spec=pltpu.PrefetchScalarGridSpec(
            num_scalar_prefetch=0,
            grid=(grid_m, n_k),
            in_specs=[
                # x tile marches along batch, constant across hidden chunks
                # (Pallas skips the re-DMA when the block index is unchanged).
                pl.BlockSpec((tm, in_p), lambda i, k: (i, 0)),
                # Streamed hidden-dim chunks of W1 / b1 / W2.
                pl.BlockSpec((in_p, tk), lambda i, k: (0, k)),
                pl.BlockSpec((1, tk), lambda i, k: (0, k)),
                pl.BlockSpec((tk, out_p), lambda i, k: (k, 0)),
                # b2 constant across the whole grid.
                pl.BlockSpec((1, out_p), lambda i, k: (0, 0)),
            ],
            out_specs=pl.BlockSpec((tm, out_p), lambda i, k: (i, 0)),
            scratch_shapes=[pltpu.VMEM((tm, out_p), jnp.float32)],
        ),
        compiler_params=pltpu.CompilerParams(
            dimension_semantics=("parallel", "arbitrary"),
            vmem_limit_bytes=vmem_limit,
        ),
    )(x_p, w1_p, b1_p, w2_p, b2_p)

    return out_padded[:B, :out_f]


def init_mlp_params(key, input_size, hidden_units, output_size, dtype=jnp.float32):
    """Deterministic PyTorch-style (uniform +-1/sqrt(fan_in)) initialization."""
    k1, k2, k3, k4 = jax.random.split(key, 4)
    bound1 = 1.0 / (input_size ** 0.5)
    bound2 = 1.0 / (hidden_units ** 0.5)
    # Stored as (in_features, out_features) — transpose of PyTorch layout.
    w1 = jax.random.uniform(k1, (input_size, hidden_units), dtype, -bound1, bound1)
    b1 = jax.random.uniform(k2, (1, hidden_units), dtype, -bound1, bound1)
    w2 = jax.random.uniform(k3, (hidden_units, output_size), dtype, -bound2, bound2)
    b2 = jax.random.uniform(k4, (1, output_size), dtype, -bound2, bound2)
    return w1, b1, w2, b2


if __name__ == "__main__":
    key = jax.random.PRNGKey(0)
    kx, kp = jax.random.split(key)

    # Small shapes: batch=2, channels=4, spatial=16x16 -> input_size=1024
    B, C, H, W = 2, 4, 16, 16
    input_size = C * H * W
    hidden_units = 32
    output_size = 8
    dropout_rate = 0.5  # identity in eval mode

    x = jax.random.normal(kx, (B, C, H, W), dtype=jnp.float32)
    w1, b1, w2, b2 = init_mlp_params(kp, input_size, hidden_units, output_size)

    # One-time weight preparation (hoisted out of the forward pass).
    padded_params, meta = prepare_mlp_params(w1, b1, w2, b2)

    out = mlp_forward(x, padded_params, meta)
    out = jax.block_until_ready(out)

    # Pure-JAX reference with matching precision (bf16 matmuls, f32 accumulate,
    # f32 bias/ReLU) — the zero padding in the kernel is numerically exact.
    x2d = x.reshape(B, -1)
    h_ref = jnp.dot(x2d.astype(jnp.bfloat16), w1.astype(jnp.bfloat16),
                    preferred_element_type=jnp.float32) + b1
    h_ref = jnp.maximum(h_ref, 0.0)
    ref = jnp.dot(h_ref.astype(jnp.bfloat16), w2.astype(jnp.bfloat16),
                  preferred_element_type=jnp.float32) + b2

    assert out.shape == (B, output_size)
    assert jnp.allclose(out, ref, atol=1e-2, rtol=1e-2), "mismatch vs reference"

    print("KERNEL_OK")
</pallas_src>

<mosaic_0001>
module attributes {stable_mosaic.version = 11 : i64} {
  func.func @mlp_kernel(%arg0: i32, %arg1: i32, %arg2: memref<8x1024xbf16, #tpu.memory_space<vmem>>, %arg3: memref<1024x128xbf16, #tpu.memory_space<vmem>>, %arg4: memref<1x128xf32, #tpu.memory_space<vmem>>, %arg5: memref<128x128xbf16, #tpu.memory_space<vmem>>, %arg6: memref<1x128xf32, #tpu.memory_space<vmem>>, %arg7: memref<8x128xf32, #tpu.memory_space<vmem>>, %arg8: memref<8x128xf32, #tpu.memory_space<vmem>>) attributes {dimension_semantics = [#tpu.dimension_semantics<parallel>, #tpu.dimension_semantics<arbitrary>], iteration_bounds = array<i64: 1, 1>, scalar_prefetch = 0 : i64, scratch_operands = 1 : i64, tpu.core_type = #tpu.core_type<tc>, window_params = [{transform_indices = @transform_0, window_bounds = array<i64: 8, 1024>}, {transform_indices = @transform_1, window_bounds = array<i64: 1024, 128>}, {transform_indices = @transform_2, window_bounds = array<i64: 1, 128>}, {transform_indices = @transform_3, window_bounds = array<i64: 128, 128>}, {pipeline_mode = #tpu.pipeline_mode<synchronous>, transform_indices = @transform_4, window_bounds = array<i64: 1, 128>}, {transform_indices = @transform_5, window_bounds = array<i64: 8, 128>}]} {
    %c0_i32 = arith.constant 0 : i32
    %0 = arith.cmpi eq, %arg1, %c0_i32 : i32
    %1 = arith.extui %0 : i1 to i32
    %c0_i32_0 = arith.constant 0 : i32
    %2 = arith.cmpi ne, %1, %c0_i32_0 : i32
    scf.if %2 {
      %cst_16 = arith.constant 0.000000e+00 : f32
      %20 = vector.broadcast %cst_16 : f32 to vector<8x128xf32>
      %c0_17 = arith.constant 0 : index
      %c0_18 = arith.constant 0 : index
      %21 = vector.load %arg8[%c0_17, %c0_18] : memref<8x128xf32, #tpu.memory_space<vmem>>, vector<8x128xf32>
      tpu.vector_store %arg8[%c0_17, %c0_18], %20 {strides = array<i32>} : memref<8x128xf32, #tpu.memory_space<vmem>>, vector<8x128xf32>,
    } else {
    }
    %c0 = arith.constant 0 : index
    %c0_1 = arith.constant 0 : index
    %3 = vector.load %arg2[%c0, %c0_1] : memref<8x1024xbf16, #tpu.memory_space<vmem>>, vector<8x1024xbf16>
    %c0_2 = arith.constant 0 : index
    %c0_3 = arith.constant 0 : index
    %4 = vector.load %arg3[%c0_2, %c0_3] : memref<1024x128xbf16, #tpu.memory_space<vmem>>, vector<1024x128xbf16>
    %cst = arith.constant dense<0.000000e+00> : vector<8x128xf32>
    %5 = tpu.matmul %3, %4, %cst {dimension_numbers = #tpu.dot_dimension_numbers<[1], [0], [0], [1], [0, 0, 1, 1], [], []>} : vector<8x1024xbf16>, vector<1024x128xbf16>, vector<8x128xf32> -> vector<8x128xf32>
    %c0_4 = arith.constant 0 : index
    %c0_5 = arith.constant 0 : index
    %6 = vector.load %arg4[%c0_4, %c0_5] : memref<1x128xf32, #tpu.memory_space<vmem>>, vector<1x128xf32>
    %7 = vector.broadcast %6 : vector<1x128xf32> to vector<8x128xf32>
    %8 = arith.addf %5, %7 : vector<8x128xf32>
    %cst_6 = arith.constant 0.000000e+00 : f32
    %9 = vector.broadcast %cst_6 : f32 to vector<8x128xf32>
    %10 = arith.maximumf %8, %9 : vector<8x128xf32>
    %c0_7 = arith.constant 0 : index
    %c0_8 = arith.constant 0 : index
    %11 = vector.load %arg8[%c0_7, %c0_8] : memref<8x128xf32, #tpu.memory_space<vmem>>, vector<8x128xf32>
    %12 = arith.truncf %10 : vector<8x128xf32> to vector<8x128xbf16>
    %c0_9 = arith.constant 0 : index
    %c0_10 = arith.constant 0 : index
    %13 = vector.load %arg5[%c0_9, %c0_10] : memref<128x128xbf16, #tpu.memory_space<vmem>>, vector<128x128xbf16>
    %cst_11 = arith.constant dense<0.000000e+00> : vector<8x128xf32>
    %14 = tpu.matmul %12, %13, %cst_11 {dimension_numbers = #tpu.dot_dimension_numbers<[1], [0], [0], [1], [0, 0, 1, 1], [], []>} : vector<8x128xbf16>, vector<128x128xbf16>, vector<8x128xf32> -> vector<8x128xf32>
    %15 = arith.addf %11, %14 : vector<8x128xf32>
    %c0_12 = arith.constant 0 : index
    %c0_13 = arith.constant 0 : index
    %16 = vector.load %arg8[%c0_12, %c0_13] : memref<8x128xf32, #tpu.memory_space<vmem>>, vector<8x128xf32>
    tpu.vector_store %arg8[%c0_12, %c0_13], %15 {strides = array<i32>} : memref<8x128xf32, #tpu.memory_space<vmem>>, vector<8x128xf32>,
    %c0_i32_14 = arith.constant 0 : i32
    %17 = arith.cmpi eq, %arg1, %c0_i32_14 : i32
    %18 = arith.extui %17 : i1 to i32
    %c0_i32_15 = arith.constant 0 : i32
    %19 = arith.cmpi ne, %18, %c0_i32_15 : i32
    scf.if %19 {
      %c0_16 = arith.constant 0 : index
      %c0_17 = arith.constant 0 : index
      %20 = vector.load %arg8[%c0_16, %c0_17] : memref<8x128xf32, #tpu.memory_space<vmem>>, vector<8x128xf32>
      %c0_18 = arith.constant 0 : index
      %c0_19 = arith.constant 0 : index
      %21 = vector.load %arg6[%c0_18, %c0_19] : memref<1x128xf32, #tpu.memory_space<vmem>>, vector<1x128xf32>
      %22 = vector.broadcast %21 : vector<1x128xf32> to vector<8x128xf32>
      %23 = arith.addf %20, %22 : vector<8x128xf32>
      %c0_20 = arith.constant 0 : index
      %c0_21 = arith.constant 0 : index
      %24 = vector.load %arg7[%c0_20, %c0_21] : memref<8x128xf32, #tpu.memory_space<vmem>>, vector<8x128xf32>
      tpu.vector_store %arg7[%c0_20, %c0_21], %23 {strides = array<i32>} : memref<8x128xf32, #tpu.memory_space<vmem>>, vector<8x128xf32>,
    } else {
    }
    return
  }
  func.func @transform_0(%arg0: i32, %arg1: i32) -> (i32, i32) {
    %c0_i32 = arith.constant 0 : i32
    %c0_i32_0 = arith.constant 0 : i32
    return %arg0, %c0_i32 : i32, i32
  }
  func.func @transform_1(%arg0: i32, %arg1: i32) -> (i32, i32) {
    %c0_i32 = arith.constant 0 : i32
    %c0_i32_0 = arith.constant 0 : i32
    return %c0_i32, %arg1 : i32, i32
  }
  func.func @transform_2(%arg0: i32, %arg1: i32) -> (i32, i32) {
    %c0_i32 = arith.constant 0 : i32
    %c0_i32_0 = arith.constant 0 : i32
    return %c0_i32, %arg1 : i32, i32
  }
  func.func @transform_3(%arg0: i32, %arg1: i32) -> (i32, i32) {
    %c0_i32 = arith.constant 0 : i32
    %c0_i32_0 = arith.constant 0 : i32
    return %arg1, %c0_i32 : i32, i32
  }
  func.func @transform_4(%arg0: i32, %arg1: i32) -> (i32, i32) {
    %c0_i32 = arith.constant 0 : i32
    %c0_i32_0 = arith.constant 0 : i32
    %c0_i32_1 = arith.constant 0 : i32
    return %c0_i32, %c0_i32_0 : i32, i32
  }
  func.func @transform_5(%arg0: i32, %arg1: i32) -> (i32, i32) {
    %c0_i32 = arith.constant 0 : i32
    %c0_i32_0 = arith.constant 0 : i32
    return %arg0, %c0_i32 : i32, i32
  }
}

</mosaic_0001>

<bundles_post_ra>
// kernel: tpu_custom_call.1
= control target key start
LH: loop header
LB: loop body
LE: loop exit
PB: predicated region body
PF: predicated region fallthrough
CT: control target
= control target key end

     0   :  { %10 = vsyncpa [#allocation4], 0  ;;  %s1394_s0 = inlined_call_operand.hbm [shape: bf16[8,1024], index: 0, kind: input, shape index: {}]   ;;  %s1395_s1 = inlined_call_operand.hbm [shape: bf16[1024,128], index: 1, kind: input, shape index: {}]   ;;  %s1396_s2 = inlined_call_operand.vmem [shape: f32[1,128], index: 2, kind: input, shape index: {}]   ;;  %s1397_s3 = inlined_call_operand.hbm [shape: bf16[128,128], index: 3, kind: input, shape index: {}]   ;;  %s1398_s4 = inlined_call_operand.vmem [shape: f32[1,128], index: 4, kind: input, shape index: {}]   ;;  %s1399_s5 = inlined_call_operand.hbm [shape: f32[8,128], index: 5, kind: output, shape index: {}]  }
   0x1   :  { %11 = vsyncpa [#allocation7], 0 }
   0x2   :  { %12 = vsyncpa [#allocation5], 0  ;;  %s1296_s18 = smov [#allocation6]   ;;  %s1202_s22 = scalar_lea.hbm %s1395_s1, 8192 }
   0x3   :  { %s28_s19 = sshll.u32 %s1296_s18, 4  ;;  %p1203_p0 = scmp.ne.s32.totalorder %s1395_s1, %s1202_s22  ;;  %s29_s19 = int_to_ptr.vmem [resolvable:$true] %s28_s19 }
   0x4   :  { %p1206_p1 = scmp.lt.u32.totalorder %s1202_s22, %s1395_s1 }
   0x6   :  { %p1208_p2 = pnand %p1206_p1, %p1203_p0 }
   0x8   :  { %1211 = shalt.err (!%p1208_p2)
}
   0x9   :  { %s1212_s27 = scalar_lea.vmem %s29_s19, 8192  ;;  %p1217_p4 = scmp.lt.s32.totalorder %s29_s19, %s29_s19 }
   0xa   :  { %p1213_p3 = scmp.ne.s32.totalorder %s29_s19, %s1212_s27  ;;  %p1218_p5 = scmp.lt.s32.totalorder %s1212_s27, %s1212_s27 }
   0xc   :  { %p1219_p6 = por %p1218_p5, %p1217_p4 }
   0xe   :  { %p1220_p7 = pnand %p1219_p6, %p1213_p3 }
  0x10   :  { %1223 = shalt.err (!%p1220_p7)
}
  0x11   :  { %s1297_s28 = smov 64   ;;  %s1298_s29 = smov 4  }
  0x12   :  { %34 = dma.hbm_to_vmem [thread:$0]  %s1395_s1, 8192, %s29_s19, [#allocation7], %s1297_s28, %s1297_s28, %s1298_s29  }
  0x13   :  { %s1299_s7 = smov [#allocation3]   ;;  %s1300_s9 = smov [#allocation8]  }
  0x14   :  { %s19_s8 = sshll.u32 %s1299_s7, 4  ;;  %s42_s10 = sshll.u32 %s1300_s9, 4  ;;  %s20_s8 = int_to_ptr.vmem [resolvable:$true] %s19_s8  ;;  %s43_s10 = int_to_ptr.vmem [resolvable:$true] %s42_s10 }
  0x15   :  { %s1224_s13 = scalar_lea.hbm %s1394_s0, 512 }
  0x16   :  { %p1225_p8 = scmp.ne.s32.totalorder %s1394_s0, %s1224_s13  ;;  %p1228_p9 = scmp.lt.u32.totalorder %s1224_s13, %s1394_s0 }
  0x18   :  { %p1230_p10 = pnand %p1228_p9, %p1225_p8 }
  0x1a   :  { %1233 = shalt.err (!%p1230_p10)
}
  0x1b   :  { %s1234_s1 = scalar_lea.vmem %s20_s8, 512  ;;  %p1239_p12 = scmp.lt.s32.totalorder %s20_s8, %s20_s8 }
  0x1c   :  { %p1235_p11 = scmp.ne.s32.totalorder %s20_s8, %s1234_s1  ;;  %p1240_p13 = scmp.lt.s32.totalorder %s1234_s1, %s1234_s1 }
  0x1e   :  { %p1241_p0 = por %p1240_p13, %p1239_p12 }
  0x20   :  { %p1242_p1 = pnand %p1241_p0, %p1235_p11 }
  0x22   :  { %1245 = shalt.err (!%p1242_p1)
}
  0x23   :  { %22 = dma.hbm_to_vmem [thread:$0]  %s1394_s0, 512, %s20_s8, [#allocation4]  }
  0x24   :  { %s1246_s22 = scalar_lea.hbm %s1397_s3, 1024 }
  0x25   :  { %p1247_p2 = scmp.ne.s32.totalorder %s1397_s3, %s1246_s22  ;;  %p1250_p3 = scmp.lt.u32.totalorder %s1246_s22, %s1397_s3 }
  0x27   :  { %p1252_p4 = pnand %p1250_p3, %p1247_p2 }
  0x29   :  { %1255 = shalt.err (!%p1252_p4)
}
  0x2a   :  { %s1256_s27 = scalar_lea.vmem %s43_s10, 1024  ;;  %p1261_p6 = scmp.lt.s32.totalorder %s43_s10, %s43_s10 }
  0x2b   :  { %p1257_p5 = scmp.ne.s32.totalorder %s43_s10, %s1256_s27  ;;  %p1262_p7 = scmp.lt.s32.totalorder %s1256_s27, %s1256_s27 }
  0x2d   :  { %p1263_p8 = por %p1262_p7, %p1261_p6 }
  0x2f   :  { %p1264_p9 = pnand %p1263_p8, %p1257_p5 }
  0x31   :  { %1267 = shalt.err (!%p1264_p9)
}
  0x32   :  { %48 = dma.hbm_to_vmem [thread:$0]  %s1397_s3, 1024, %s43_s10, [#allocation7], %s1297_s28, %s1297_s28, %s1298_s29  }
  0x33   :  { %1290 = dma.done.wait [#allocation4], 512  }
  0x34   :  { %1291 = vsyncadd [#allocation4], 4294966784 }
  0x35   :  { %1292 = dma.done.wait [#allocation7], 9216  }
  0x36   :  { %1293 = vsyncadd [#allocation7], 4294958080  ;;  %v1122_v0 = vld [vmem:[#allocation6 + $0x40] sm:$0xff]   ;;  %v1126_v4 = vld [vmem:[#allocation6 + $0x48] sm:$0xff]   ;;  %vm1302_vm0 = vmmov 0   ;;  %s1303_s6 = smov [#allocation9]  }
  0x37   :  { %v1123_v1 = vld [vmem:[#allocation6 + $0xc0] sm:$0xff]   ;;  %997 = vmatprep.subr.bf16.mxu0 %v1122_v0  ;;  %v1127_v5 = vld [vmem:[#allocation6 + $0xc8] sm:$0xff]   ;;  %v1130_v8 = vld [vmem:[#allocation6 + $0x50] sm:$0xff]   ;;  %s905_s7 = sshll.u32 %s1303_s6, 4  ;;  %s906_s7 = int_to_ptr.vmem [resolvable:$true] %s905_s7 }
  0x38   :  { %v1124_v2 = vld [vmem:[#allocation6] sm:$0xff]   ;;  %1019 = vmatprep.subr.bf16.mxu1 %v1123_v1  ;;  %v1128_v6 = vld [vmem:[#allocation6 + $0x8] sm:$0xff]   ;;  %v1131_v9 = vld [vmem:[#allocation6 + $0xd0] sm:$0xff]   ;;  %s1268_s8 = scalar_lea.vmem %s906_s7, 128  ;;  %p1273_p11 = scmp.lt.s32.totalorder %s906_s7, %s906_s7 }
  0x39   :  { %v1125_v3 = vld [vmem:[#allocation6 + $0x80] sm:$0xff]   ;;  %998 = vmatpush3.bf16.msra.mxu0 %v1124_v2  ;;  %v1129_v7 = vld [vmem:[#allocation6 + $0x88] sm:$0xff]   ;;  %v1132_v10 = vld [vmem:[#allocation6 + $0x10] sm:$0xff]   ;;  %p1269_p10 = scmp.ne.s32.totalorder %s906_s7, %s1268_s8  ;;  %p1274_p12 = scmp.lt.s32.totalorder %s1268_s8, %s1268_s8 }
  0x3a   :  { %1020 = vmatpush3.bf16.msra.mxu1 %v1125_v3  ;;  %999 = vmatprep.subr.bf16.mxu0 %v1126_v4  ;;  %v1133_v11 = vld [vmem:[#allocation6 + $0x90] sm:$0xff]   ;;  %v1134_v12 = vld [vmem:[#allocation6 + $0x58] sm:$0xff]   ;;  %v1138_v16 = vld [vmem:[#allocation6 + $0x60] sm:$0xff]  }
  0x3b   :  { %1021 = vmatprep.subr.bf16.mxu1 %v1127_v5  ;;  %v1135_v13 = vld [vmem:[#allocation6 + $0xd8] sm:$0xff]   ;;  %v1139_v17 = vld [vmem:[#allocation6 + $0xe0] sm:$0xff]   ;;  %v1142_v20 = vld [vmem:[#allocation6 + $0x68] sm:$0xff]   ;;  %p1275_p13 = por %p1274_p12, %p1273_p11 }
  0x3c   :  { %v1136_v14 = vld [vmem:[#allocation6 + $0x18] sm:$0xff]   ;;  %v1140_v18 = vld [vmem:[#allocation6 + $0x20] sm:$0xff]   ;;  %v1143_v21 = vld [vmem:[#allocation6 + $0xe8] sm:$0xff]  }
  0x3d   :  { %1000 = vmatpush3.bf16.msra.mxu0 %v1128_v6  ;;  %v1137_v15 = vld [vmem:[#allocation6 + $0x98] sm:$0xff]   ;;  %v1141_v19 = vld [vmem:[#allocation6 + $0xa0] sm:$0xff]   ;;  %v1144_v22 = vld [vmem:[#allocation6 + $0x28] sm:$0xff]   ;;  %p1276_p0 = pnand %p1275_p13, %p1269_p10 }
  0x3e   :  { %1022 = vmatpush3.bf16.msra.mxu1 %v1129_v7  ;;  %1001 = vmatprep.subr.bf16.mxu0 %v1130_v8  ;;  %v1145_v23 = vld [vmem:[#allocation6 + $0xa8] sm:$0xff]   ;;  %v1146_v24 = vld [vmem:[#allocation6 + $0x70] sm:$0xff]   ;;  %v1150_v28 = vld [vmem:[#allocation6 + $0x78] sm:$0xff]  }
  0x3f   :  { %1023 = vmatprep.subr.bf16.mxu1 %v1131_v9  ;;  %v1147_v25 = vld [vmem:[#allocation6 + $0xf0] sm:$0xff]   ;;  %v1151_v29 = vld [vmem:[#allocation6 + $0xf8] sm:$0xff]   ;;  %v66_v32 = vld [vmem:[#allocation3] sm:$0xff] }
  0x40   :  { %v1148_v26 = vld [vmem:[#allocation6 + $0x30] sm:$0xff]   ;;  %v1152_v30 = vld [vmem:[#allocation6 + $0x38] sm:$0xff]   ;;  %v67_v33 = vld [vmem:[#allocation3 + $0x8] sm:$0xff]  ;;  %v916_v34 = vcombine.low %v66_v32, %v66_v32  ;;  %v917_v35 = vcombine.high %v66_v32, %v66_v32 }
  0x41   :  { %1002 = vmatpush3.bf16.msra.mxu0 %v1132_v10  ;;  %v1149_v27 = vld [vmem:[#allocation6 + $0xb0] sm:$0xff]   ;;  %v1153_v31 = vld [vmem:[#allocation6 + $0xb8] sm:$0xff]   ;;  %v918_v36 = vcombine.low %v67_v33, %v67_v33  ;;  %v919_v37 = vcombine.high %v67_v33, %v67_v33  ;;  %v1158_v38 = vld [vmem:[#allocation6 + $0x140] sm:$0xff]  }
  0x42   :  { %1024 = vmatpush3.bf16.msra.mxu1 %v1133_v11  ;;  %1003 = vmatprep.subr.bf16.mxu0 %v1134_v12  ;;  %v1159_v39 = vld [vmem:[#allocation6 + $0x1c0] sm:$0xff]   ;;  %v1162_v42 = vld [vmem:[#allocation6 + $0x148] sm:$0xff]   ;;  %v1166_v46 = vld [vmem:[#allocation6 + $0x150] sm:$0xff]  }
  0x43   :  { %1025 = vmatprep.subr.bf16.mxu1 %v1135_v13  ;;  %649 = vmatprep.mubr.bf16.mxu0 %v917_v35  ;;  %v1160_v40 = vld [vmem:[#allocation6 + $0x100] sm:$0xff]   ;;  %v1163_v43 = vld [vmem:[#allocation6 + $0x1c8] sm:$0xff]   ;;  %v1167_v47 = vld [vmem:[#allocation6 + $0x1d0] sm:$0xff]   ;;  %v1301_v13 = vmov 0.0  }
  0x44   :  { %689 = vmatprep.mubr.bf16.mxu1 %v919_v37  ;;  %v1161_v41 = vld [vmem:[#allocation6 + $0x180] sm:$0xff]   ;;  %v1164_v44 = vld [vmem:[#allocation6 + $0x108] sm:$0xff]   ;;  %v1168_v48 = vld [vmem:[#allocation6 + $0x110] sm:$0xff]  }
  0x45   :  { %1004 = vmatpush3.bf16.msra.mxu0 %v1136_v14  ;;  %v1165_v45 = vld [vmem:[#allocation6 + $0x188] sm:$0xff]   ;;  %v1169_v49 = vld [vmem:[#allocation6 + $0x190] sm:$0xff]   ;;  %v1170_v50 = vld [vmem:[#allocation6 + $0x158] sm:$0xff]  }
  0x46   :  { %1026 = vmatpush3.bf16.msra.mxu1 %v1137_v15  ;;  %1005 = vmatprep.subr.bf16.mxu0 %v1138_v16  ;;  %v1171_v51 = vld [vmem:[#allocation6 + $0x1d8] sm:$0xff]   ;;  %v1174_v54 = vld [vmem:[#allocation6 + $0x160] sm:$0xff]   ;;  %v1178_v58 = vld [vmem:[#allocation6 + $0x168] sm:$0xff]  }
  0x47   :  { %1027 = vmatprep.subr.bf16.mxu1 %v1139_v17  ;;  %v1172_v52 = vld [vmem:[#allocation6 + $0x118] sm:$0xff]   ;;  %v1175_v55 = vld [vmem:[#allocation6 + $0x1e0] sm:$0xff]   ;;  %v1179_v59 = vld [vmem:[#allocation6 + $0x1e8] sm:$0xff]  }
  0x48   :  { %v1173_v53 = vld [vmem:[#allocation6 + $0x198] sm:$0xff]   ;;  %v1176_v56 = vld [vmem:[#allocation6 + $0x120] sm:$0xff]   ;;  %v1180_v60 = vld [vmem:[#allocation6 + $0x128] sm:$0xff]  }
  0x49   :  { %1006 = vmatpush3.bf16.msra.mxu0 %v1140_v18  ;;  %v1177_v57 = vld [vmem:[#allocation6 + $0x1a0] sm:$0xff]   ;;  %v1181_v61 = vld [vmem:[#allocation6 + $0x1a8] sm:$0xff]   ;;  %v1182_v62 = vld [vmem:[#allocation6 + $0x170] sm:$0xff]  }
  0x4a   :  { %1028 = vmatpush3.bf16.msra.mxu1 %v1141_v19  ;;  %1007 = vmatprep.subr.bf16.mxu0 %v1142_v20  ;;  %v1183_v63 = vld [vmem:[#allocation6 + $0x1f0] sm:$0xff]   ;;  %v1186_v2 = vld [vmem:[#allocation6 + $0x178] sm:$0xff]   ;;  %v1194_v12 = vld [vmem:[#allocation8] sm:$0xff]  }
  0x4b   :  { %1029 = vmatprep.subr.bf16.mxu1 %v1143_v21  ;;  %v1184_v0 = vld [vmem:[#allocation6 + $0x130] sm:$0xff]   ;;  %v1187_v3 = vld [vmem:[#allocation6 + $0x1f8] sm:$0xff]   ;;  %v1195_v14 = vld [vmem:[#allocation8 + $0x8] sm:$0xff]  }
  0x4c   :  { %v1185_v1 = vld [vmem:[#allocation6 + $0x1b0] sm:$0xff]   ;;  %v1188_v4 = vld [vmem:[#allocation6 + $0x138] sm:$0xff]   ;;  %v1198_v17 = vld [vmem:[#allocation8 + $0x20] sm:$0xff]  }
  0x4d   :  { %1008 = vmatpush3.bf16.msra.mxu0 %v1144_v22  ;;  %v1189_v5 = vld [vmem:[#allocation6 + $0x1b8] sm:$0xff]   ;;  %v68_v6 = vld [vmem:[#allocation3 + $0x10] sm:$0xff]  ;;  %v1199_v18 = vld [vmem:[#allocation8 + $0x28] sm:$0xff]  }
  0x4e   :  { %1030 = vmatpush3.bf16.msra.mxu1 %v1145_v23  ;;  %1009 = vmatprep.subr.bf16.mxu0 %v1146_v24  ;;  %v920_v7 = vcombine.low %v68_v6, %v68_v6  ;;  %v921_v8 = vcombine.high %v68_v6, %v68_v6  ;;  %v69_v9 = vld [vmem:[#allocation3 + $0x18] sm:$0xff]  ;;  %v1196_v15 = vld [vmem:[#allocation8 + $0x10] sm:$0xff]   ;;  %v915_v23 = vld [vmem:[%s1396_s2] ss:$0 sm:$0xff] }
  0x4f   :  { %1031 = vmatprep.subr.bf16.mxu1 %v1147_v25  ;;  %v922_v10 = vcombine.low %v69_v9, %v69_v9  ;;  %v923_v11 = vcombine.high %v69_v9, %v69_v9  ;;  %v1197_v16 = vld [vmem:[#allocation8 + $0x18] sm:$0xff]   ;;  %v1200_v19 = vld [vmem:[#allocation8 + $0x30] sm:$0xff]  }
  0x50   :  { %v1201_v20 = vld [vmem:[#allocation8 + $0x38] sm:$0xff]  }
  0x51   :  { %1010 = vmatpush3.bf16.msra.mxu0 %v1148_v26 }
  0x52   :  { %1032 = vmatpush3.bf16.msra.mxu1 %v1149_v27  ;;  %1011 = vmatprep.subr.bf16.mxu0 %v1150_v28 }
  0x53   :  { %1033 = vmatprep.subr.bf16.mxu1 %v1151_v29 }
  0x55   :  { %1012 = vmatpush3.bf16.msra.mxu0 %v1152_v30 }
  0x56   :  { %1034 = vmatpush3.bf16.msra.mxu1 %v1153_v31  ;;  %1041 = vmatprep.subr.bf16.mxu0 %v1158_v38 }
  0x57   :  { %1063 = vmatprep.subr.bf16.mxu1 %v1159_v39 }
  0x58   :  { %650 = vmatmul.mubr.bf16.vlgmr.msra.gmra.mrb[0].mxu0 %v916_v34 }
  0x59   :  { %690 = vmatmul.mubr.bf16.vlgmr.msra.gmra.mrb[0].mxu1 %v918_v36  ;;  %1042 = vmatpush3.bf16.msra.mxu0 %v1160_v40 }
  0x5a   :  { %1064 = vmatpush3.bf16.msra.mxu1 %v1161_v41  ;;  %1043 = vmatprep.subr.bf16.mxu0 %v1162_v42 }
  0x5b   :  { %1065 = vmatprep.subr.bf16.mxu1 %v1163_v43  ;;  %729 = vmatprep.mubr.bf16.mxu0 %v921_v8 }
  0x5c   :  { %769 = vmatprep.mubr.bf16.mxu1 %v923_v11 }
  0x5d   :  { %1044 = vmatpush3.bf16.msra.mxu0 %v1164_v44 }
  0x5e   :  { %1066 = vmatpush3.bf16.msra.mxu1 %v1165_v45  ;;  %1045 = vmatprep.subr.bf16.mxu0 %v1166_v46 }
  0x5f   :  { %1067 = vmatprep.subr.bf16.mxu1 %v1167_v47 }
  0x61   :  { %1046 = vmatpush3.bf16.msra.mxu0 %v1168_v48  ;;  %v996_v48 = vld [vmem:[%s1398_s4] ss:$0 sm:$0xff] }
  0x62   :  { %1068 = vmatpush3.bf16.msra.mxu1 %v1169_v49  ;;  %1047 = vmatprep.subr.bf16.mxu0 %v1170_v50 }
  0x63   :  { %1069 = vmatprep.subr.bf16.mxu1 %v1171_v51 }
  0x65   :  { %1048 = vmatpush3.bf16.msra.mxu0 %v1172_v52 }
  0x66   :  { %1070 = vmatpush3.bf16.msra.mxu1 %v1173_v53  ;;  %1049 = vmatprep.subr.bf16.mxu0 %v1174_v54 }
  0x67   :  { %1071 = vmatprep.subr.bf16.mxu1 %v1175_v55 }
  0x69   :  { %1050 = vmatpush3.bf16.msra.mxu0 %v1176_v56 }
  0x6a   :  { %1072 = vmatpush3.bf16.msra.mxu1 %v1177_v57  ;;  %1051 = vmatprep.subr.bf16.mxu0 %v1178_v58 }
  0x6b   :  { %1073 = vmatprep.subr.bf16.mxu1 %v1179_v59 }
  0x6d   :  { %1052 = vmatpush3.bf16.msra.mxu0 %v1180_v60 }
  0x6e   :  { %1074 = vmatpush3.bf16.msra.mxu1 %v1181_v61  ;;  %1053 = vmatprep.subr.bf16.mxu0 %v1182_v62 }
  0x6f   :  { %1075 = vmatprep.subr.bf16.mxu1 %v1183_v63 }
  0x71   :  { %1054 = vmatpush3.bf16.msra.mxu0 %v1184_v0 }
  0x72   :  { %1076 = vmatpush3.bf16.msra.mxu1 %v1185_v1  ;;  %1055 = vmatprep.subr.bf16.mxu0 %v1186_v2 }
  0x73   :  { %1077 = vmatprep.subr.bf16.mxu1 %v1187_v3 }
  0x75   :  { %1056 = vmatpush3.bf16.msra.mxu0 %v1188_v4 }
  0x76   :  { %1078 = vmatpush3.bf16.msra.mxu1 %v1189_v5  ;;  %1094 = vmatprep.subr.bf16.mxu0 %v1301_v13 }
  0x78   :  { %730 = vmatmul.mubr.bf16.vlgmr.msra.gmra.mrb[4].mxu0 %v920_v7 }
  0x79   :  { %770 = vmatmul.mubr.bf16.vlgmr.msra.gmra.mrb[4].mxu1 %v922_v10  ;;  %1095 = vmatpush3.bf16.msra.mxu0 %v1194_v12 }
  0x7a   :  { %1096 = vmatprep.subr.bf16.mxu0 %v1301_v13  ;;  %1110 = vmatprep.mubr.msk.bf16.mxu0 %vm1302_vm0, %v1301_v13 }
  0x7d   :  { %1097 = vmatpush3.bf16.msra.mxu0 %v1195_v14 }
  0x7e   :  { %1098 = vmatprep.subr.bf16.mxu0 %v1301_v13 }
  0x81   :  { %1099 = vmatpush3.bf16.msra.mxu0 %v1196_v15 }
  0x82   :  { %1100 = vmatprep.subr.bf16.mxu0 %v1301_v13 }
  0x85   :  { %1101 = vmatpush3.bf16.msra.mxu0 %v1197_v16 }
  0x86   :  { %1102 = vmatprep.subr.bf16.mxu0 %v1301_v13 }
  0x89   :  { %1103 = vmatpush3.bf16.msra.mxu0 %v1198_v17 }
  0x8a   :  { %1104 = vmatprep.subr.bf16.mxu0 %v1301_v13 }
  0x8d   :  { %1105 = vmatpush3.bf16.msra.mxu0 %v1199_v18 }
  0x8e   :  { %1106 = vmatprep.subr.bf16.mxu0 %v1301_v13 }
  0x91   :  { %1107 = vmatpush3.bf16.msra.mxu0 %v1200_v19 }
  0x92   :  { %1108 = vmatprep.subr.bf16.mxu0 %v1301_v13 }
  0x95   :  { %1109 = vmatpush3.bf16.msra.mxu0 %v1201_v20 }
 0x12b   :  { %v1013_v21 = vpop.f32.mrb[0].mxu0 }
 0x12c   :  { %v1035_v22 = vpop.f32.mrb[0].mxu1  ;;  %v1014_v24 = vpop.f32.mrb[1].mxu0 }
 0x12d   :  { %v1036_v25 = vpop.f32.mrb[1].mxu1  ;;  %v1015_v26 = vadd.f32 %v1014_v24, %v1013_v21  ;;  %v1016_v28 = vpop.f32.mrb[2].mxu0 }
 0x12e   :  { %v1037_v27 = vadd.f32 %v1036_v25, %v1035_v22  ;;  %v1038_v29 = vpop.f32.mrb[2].mxu1  ;;  %v1017_v30 = vpop.f32.mrb[3].mxu0 }
 0x12f   :  { %v1039_v31 = vpop.f32.mrb[3].mxu1  ;;  %v652_v32 = vadd.f32 %v1015_v26, %v915_v23 }
 0x131   :  { %v692_v33 = vadd.f32 %v1037_v27, %v652_v32 }
 0x14b   :  { %v1057_v34 = vpop.f32.mrb[4].mxu0 }
 0x14c   :  { %v1079_v35 = vpop.f32.mrb[4].mxu1  ;;  %v1058_v36 = vpop.f32.mrb[5].mxu0 }
 0x14d   :  { %v1080_v37 = vpop.f32.mrb[5].mxu1  ;;  %v1059_v38 = vadd.f32 %v1058_v36, %v1057_v34  ;;  %v1060_v40 = vpop.f32.mrb[6].mxu0 }
 0x14e   :  { %v1081_v39 = vadd.f32 %v1080_v37, %v1079_v35  ;;  %v1082_v41 = vpop.f32.mrb[6].mxu1  ;;  %v1061_v42 = vpop.f32.mrb[7].mxu0 }
 0x14f   :  { %v1083_v43 = vpop.f32.mrb[7].mxu1  ;;  %v732_v44 = vadd.f32 %v1059_v38, %v692_v33 }
 0x151   :  { %v772_v45 = vadd.f32 %v1081_v39, %v732_v44 }
 0x153   :  { %v777_v46 = vmax.f32 %v772_v45, 0.0 }
 0x155   :  { %v779_v47 = vpack.c.bf16 %v777_v46, %v777_v46 }
 0x157   :  { %1111 = vmatmul.mubr.bf16.vlgmr.msra.gmra.mrb[8].mxu0 %v779_v47 }
 0x22a   :  { %v878_v49 = vpop.f32.mrb[8].mxu0 }
 0x22b   :  { %v897_v50 = vadd.f32 %v996_v48, %v878_v49  ;;  %v1112_v51 = vpop.f32.mrb[9].mxu0 }
 0x22c   :  { %v881_v52 = vpop.f32.mrb[10].mxu0 }
 0x22d   :  { %898 = vst [vmem:[#allocation9] sm:$0xff] %v897_v50  ;;  %v1113_v53 = vpop.f32.mrb[11].mxu0 }
 0x22e   :  { %1279 = shalt.err (!%p1276_p0)
}
 0x22f   :  { %s1280_s4 = scalar_lea.hbm %s1399_s5, 128 }
 0x230   :  { %p1281_p1 = scmp.ne.s32.totalorder %s1399_s5, %s1280_s4  ;;  %p1284_p2 = scmp.lt.u32.totalorder %s1280_s4, %s1399_s5 }
 0x232   :  { %p1286_p3 = pnand %p1284_p2, %p1281_p1 }
 0x234   :  { %1289 = shalt.err (!%p1286_p3)
}
 0x235   :  { %908 = dma.vmem_to_hbm [thread:$0]  %s906_s7, 128, %s1399_s5, [#allocation5]  }
 0x236   :  { %1294 = dma.done.wait [#allocation5], 128  }
 0x237   :  { %1295 = vsyncadd [#allocation5], 4294967168 }
 0x238   :  { %912 = vsyncpa [#allocation4], 1 }
 0x239   :  { %913 = vsyncpa [#allocation7], 1 }
 0x23a   :  { %914 = vsyncpa [#allocation5], 1 }

</bundles_post_ra>
